<compile_context>
chip_gen: v7x
topology: tpu7x:2x2x1
jax: 0.10.0
libtpu: 0.0.40
codegen_flags: <defaults>
</compile_context>

<pallas_src>
import jax
import jax.numpy as jnp
from jax import lax
from jax.experimental import pallas as pl
from jax.experimental.pallas import tpu as pltpu


def _round_up(x, m):
    return ((x + m - 1) // m) * m


def _make_rnn_decoder_kernel(T_real, Tc, unroll):
    """Builds the kernel body, closed over the static sequence parameters."""

    def kernel(x_ref, wih_ref, whh_ref, b_ref, h0_ref, c0_ref,
               wcls_ref, bcls_ref,
               logp_ref, hn_ref, cn_ref,
               xg_scratch, h_scratch):
        H = h0_ref.shape[1]
        chunk = pl.program_id(0)

        # Initialize the resident (h, c) carry from the encoder state.
        @pl.when(chunk == 0)
        def _():
            hn_ref[...] = h0_ref[...]
            cn_ref[...] = c0_ref[...]

        # ---- Phase 1: batched input projection for this chunk (off the serial
        # chain).  MXU operands may be bf16; accumulation is f32.
        xg_scratch[...] = (
            jnp.dot(x_ref[...], wih_ref[...],
                    preferred_element_type=jnp.float32)
            + b_ref[...])

        # TODO(synk): keeping w_hh staged in the MXU across the recurrence via
        # pltpu.matmul_push_rhs / matmul_acc_lhs / matmul_pop (perf review
        # item 2) is deferred: the explicit MXU-drive path is not validated
        # for a 1-row LHS and a lowering failure costs more than re-staging.
        whh = whh_ref[...]                       # resident across the recurrence
        mx_dtype = whh.dtype

        # ---- Phase 2: serial LSTM recurrence (only loop-carried work remains).
        def step(t, carry):
            h, c = carry                                            # (1, H) f32
            gates = (xg_scratch[pl.ds(t, 1), :]
                     + jnp.dot(h.astype(mx_dtype), whh,
                               preferred_element_type=jnp.float32))  # (1,4H) f32
            # 2 EUP passes over the whole 4H gate vector instead of 4 slices.
            sig = jax.nn.sigmoid(gates)
            tah = jnp.tanh(gates)
            # TODO(synk): these 32-lane-offset slices may lower to cross-lane
            # relayouts on the serial chain (perf review item 3); replacing
            # them with pltpu.roll alignment or sublane-reordered weights is
            # deferred until a bundle dump confirms the cost.
            i_g = sig[:, 0 * H:1 * H]
            f_g = sig[:, 1 * H:2 * H]
            g_g = tah[:, 2 * H:3 * H]
            o_g = sig[:, 3 * H:4 * H]
            c_new = f_g * c + i_g * g_g
            h_new = o_g * jnp.tanh(c_new)
            h_scratch[pl.ds(t, 1), :] = h_new
            if T_real % Tc != 0:
                # Freeze the carry on padded trailing steps of the last chunk.
                valid = (chunk * Tc + t) < T_real
                h_new = jnp.where(valid, h_new, h)
                c_new = jnp.where(valid, c_new, c)
            return h_new, c_new

        h_n, c_n = lax.fori_loop(0, Tc, step, (hn_ref[...], cn_ref[...]),
                                 unroll=unroll)
        hn_ref[...] = h_n
        cn_ref[...] = c_n

        # ---- Phase 3: batched classifier + log_softmax, one lane-dense store.
        logits = (jnp.dot(h_scratch[...].astype(mx_dtype), wcls_ref[...],
                          preferred_element_type=jnp.float32)
                  + bcls_ref[...])                                # (Tc, O_pad)
        m = jnp.max(logits, axis=-1, keepdims=True)
        lse = m + jnp.log(jnp.sum(jnp.exp(logits - m), axis=-1, keepdims=True))
        logp_ref[...] = logits - lse

    return kernel


def rnn_decoder_forward(emb_inputs, enc_hidden, params, isHidden=False,
                        context=None, use_bf16=True, t_chunk=256):
    """JAX/Pallas equivalent of RNNDecoder.forward (isHidden=False path)."""
    if isHidden:
        # TODO(synk): the isHidden=True branch of the reference module uses an
        # undefined `weighted_sum` and an invalid torch.cat call; fail loudly
        # instead of silently returning the isHidden=False result.
        raise NotImplementedError(
            "RNNDecoder.forward(isHidden=True) is broken in the reference "
            "module and is not implemented.")
    del context

    T, E = emb_inputs.shape
    H = params["w_hh"].shape[0]
    O = params["w_cls"].shape[1]
    O_pad = max(128, _round_up(O, 128))          # lane-dense classifier output
    mx_dtype = jnp.bfloat16 if use_bf16 else jnp.float32

    # T chunking: chunk is a multiple of 8 (sublane constraint); T is padded to
    # a multiple of the chunk; padded steps are masked inside the kernel.
    Tc = _round_up(min(t_chunk, _round_up(T, 8)), 8)
    T_pad = _round_up(T, Tc)
    nT = T_pad // Tc
    unroll = True if Tc <= 32 else 8

    # MXU operands in bf16 (or f32 when disabled); everything else f32.
    x = emb_inputs.astype(mx_dtype)
    if T_pad != T:
        x = jnp.zeros((T_pad, E), mx_dtype).at[:T, :].set(x)
    wih = params["w_ih"].astype(mx_dtype)                       # (E, 4H)
    whh = params["w_hh"].astype(mx_dtype)                       # (H, 4H)
    b = (params["b_ih"] + params["b_hh"]).reshape(1, 4 * H).astype(jnp.float32)
    h0 = enc_hidden[0].reshape(1, H).astype(jnp.float32)
    c0 = enc_hidden[1].reshape(1, H).astype(jnp.float32)
    # Pad classifier weights/bias to O_pad lanes.  Padded bias columns get a
    # large negative value so padded logits contribute exactly 0 to the sum.
    wcls_pad = jnp.zeros((H, O_pad), mx_dtype).at[:, :O].set(
        params["w_cls"].astype(mx_dtype))
    bcls_pad = jnp.full((1, O_pad), -1e30, jnp.float32).at[:, :O].set(
        params["b_cls"].reshape(1, O).astype(jnp.float32))

    # Scoped-VMEM limit sized from the actual per-step footprint (+margin).
    wb = jnp.dtype(mx_dtype).itemsize
    footprint = (
        2 * Tc * E * wb                                  # x chunk, dbl-buffered
        + (E * 4 * H + H * 4 * H + H * O_pad) * wb       # resident weights
        + (4 * H + O_pad + 4 * H) * 4                    # biases + h0/c0/hn/cn
        + 2 * Tc * O_pad * 4                             # logp chunk, dbl-buffered
        + Tc * 4 * H * 4 + Tc * H * 4)                   # scratches
    vmem_limit = int(min(64 * 1024 * 1024, max(32 * 1024 * 1024, 2 * footprint)))

    cost = pl.CostEstimate(
        flops=int(2 * T_pad * E * 4 * H + 2 * T_pad * H * 4 * H
                  + 2 * T_pad * H * O_pad + 10 * T_pad * H),
        transcendentals=int(T_pad * (2 * 4 * H + H) + 2 * T_pad * O_pad),
        bytes_accessed=int(T_pad * E * wb
                           + (E * 4 * H + H * 4 * H + H * O_pad) * wb
                           + (2 * 4 * H + O_pad + 4 * H) * 4
                           + T_pad * O_pad * 4),
    )

    kernel = _make_rnn_decoder_kernel(T, Tc, unroll)
    grid_spec = pltpu.PrefetchScalarGridSpec(
        num_scalar_prefetch=0,
        grid=(nT,),
        in_specs=[
            pl.BlockSpec((Tc, E), lambda t: (t, 0)),            # x chunk
            pl.BlockSpec((E, 4 * H), lambda t: (0, 0)),         # w_ih (resident)
            pl.BlockSpec((H, 4 * H), lambda t: (0, 0)),         # w_hh (resident)
            pl.BlockSpec((1, 4 * H), lambda t: (0, 0)),         # b
            pl.BlockSpec((1, H), lambda t: (0, 0)),             # h0
            pl.BlockSpec((1, H), lambda t: (0, 0)),             # c0
            pl.BlockSpec((H, O_pad), lambda t: (0, 0)),         # w_cls (resident)
            pl.BlockSpec((1, O_pad), lambda t: (0, 0)),         # b_cls
        ],
        out_specs=(
            pl.BlockSpec((Tc, O_pad), lambda t: (t, 0)),        # log_probs chunk
            pl.BlockSpec((1, H), lambda t: (0, 0)),             # h_n (carry)
            pl.BlockSpec((1, H), lambda t: (0, 0)),             # c_n (carry)
        ),
        scratch_shapes=[pltpu.VMEM((Tc, 4 * H), jnp.float32),
                        pltpu.VMEM((Tc, H), jnp.float32)],
    )

    logp_pad, h_n, c_n = pl.pallas_call(
        kernel,
        out_shape=(
            jax.ShapeDtypeStruct((T_pad, O_pad), jnp.float32),
            jax.ShapeDtypeStruct((1, H), jnp.float32),
            jax.ShapeDtypeStruct((1, H), jnp.float32),
        ),
        grid_spec=grid_spec,
        compiler_params=pltpu.CompilerParams(
            dimension_semantics=("arbitrary",),
            vmem_limit_bytes=vmem_limit),
        cost_estimate=cost,
    )(x, wih, whh, b, h0, c0, wcls_pad, bcls_pad)

    # TODO(synk): at large vocab sizes, return the O_pad-wide block and crop
    # lazily downstream (this crop is an extra HBM pass over the largest array).
    log_probs = logp_pad[:T, :O]
    hidden = (h_n.reshape(1, 1, H), c_n.reshape(1, 1, H))
    return log_probs, hidden


def rnn_decoder_ref(emb_inputs, enc_hidden, params):
    """Pure-JAX f32 reference (same math) for a correctness check."""
    H = params["w_hh"].shape[0]
    h = enc_hidden[0].reshape(1, H)
    c = enc_hidden[1].reshape(1, H)
    b = (params["b_ih"] + params["b_hh"]).reshape(1, -1)
    outs = []
    for t in range(emb_inputs.shape[0]):
        x_t = emb_inputs[t:t + 1]
        gates = x_t @ params["w_ih"] + h @ params["w_hh"] + b
        i_g, f_g, g_g, o_g = jnp.split(gates, 4, axis=1)
        i_g = jax.nn.sigmoid(i_g)
        f_g = jax.nn.sigmoid(f_g)
        g_g = jnp.tanh(g_g)
        o_g = jax.nn.sigmoid(o_g)
        c = f_g * c + i_g * g_g
        h = o_g * jnp.tanh(c)
        logits = h @ params["w_cls"] + params["b_cls"].reshape(1, -1)
        outs.append(jax.nn.log_softmax(logits, axis=-1))
    return jnp.concatenate(outs, 0), (h.reshape(1, 1, H), c.reshape(1, 1, H))


if __name__ == "__main__":
    # small shapes consistent with the module: seq=8, input_emb_dim=16,
    # hidden_size=32, output_size=10
    T, E, H, O = 8, 16, 32, 10

    key = jax.random.PRNGKey(0)
    ks = jax.random.split(key, 9)
    s = 1.0 / (H ** 0.5)
    params = {
        "w_ih": jax.random.uniform(ks[0], (E, 4 * H), jnp.float32, -s, s),
        "w_hh": jax.random.uniform(ks[1], (H, 4 * H), jnp.float32, -s, s),
        "b_ih": jax.random.uniform(ks[2], (4 * H,), jnp.float32, -s, s),
        "b_hh": jax.random.uniform(ks[3], (4 * H,), jnp.float32, -s, s),
        "w_cls": jax.random.uniform(ks[4], (H, O), jnp.float32, -s, s),
        "b_cls": jax.random.uniform(ks[5], (O,), jnp.float32, -s, s),
    }
    emb_inputs = jax.random.normal(ks[6], (T, E), jnp.float32)
    enc_hidden = (jax.random.normal(ks[7], (1, 1, H), jnp.float32),
                  jax.random.normal(ks[8], (1, 1, H), jnp.float32))

    # f32-MXU path: bit-comparable to the pure-f32 reference (tight tolerance).
    lp32, (h32, c32) = rnn_decoder_forward(emb_inputs, enc_hidden, params,
                                           use_bf16=False)
    # bf16-MXU path (default, per perf review): f32 accumulation + f32
    # elementwise; verified at a bf16-appropriate tolerance.
    lp16, (h16, c16) = rnn_decoder_forward(emb_inputs, enc_hidden, params,
                                           use_bf16=True)
    jax.block_until_ready((lp32, h32, c32, lp16, h16, c16))

    ref_lp, (ref_h, ref_c) = rnn_decoder_ref(emb_inputs, enc_hidden, params)

    assert lp32.shape == (T, O) and h32.shape == (1, 1, H) and c32.shape == (1, 1, H)
    assert lp16.shape == (T, O) and h16.shape == (1, 1, H) and c16.shape == (1, 1, H)
    assert jnp.allclose(lp32, ref_lp, atol=1e-3, rtol=1e-3)
    assert jnp.allclose(h32, ref_h, atol=1e-3, rtol=1e-3)
    assert jnp.allclose(c32, ref_c, atol=1e-3, rtol=1e-3)
    assert jnp.allclose(lp16, ref_lp, atol=3e-2, rtol=3e-2)
    assert jnp.allclose(h16, ref_h, atol=3e-2, rtol=3e-2)
    assert jnp.allclose(c16, ref_c, atol=3e-2, rtol=3e-2)

    print("KERNEL_OK")
</pallas_src>

<mosaic_0001>
module attributes {stable_mosaic.version = 11 : i64} {
  func.func @kernel(%arg0: i32, %arg1: memref<8x16xf32, #tpu.memory_space<vmem>>, %arg2: memref<16x128xf32, #tpu.memory_space<vmem>>, %arg3: memref<32x128xf32, #tpu.memory_space<vmem>>, %arg4: memref<1x128xf32, #tpu.memory_space<vmem>>, %arg5: memref<1x32xf32, #tpu.memory_space<vmem>>, %arg6: memref<1x32xf32, #tpu.memory_space<vmem>>, %arg7: memref<32x128xf32, #tpu.memory_space<vmem>>, %arg8: memref<1x128xf32, #tpu.memory_space<vmem>>, %arg9: memref<8x128xf32, #tpu.memory_space<vmem>>, %arg10: memref<1x32xf32, #tpu.memory_space<vmem>>, %arg11: memref<1x32xf32, #tpu.memory_space<vmem>>, %arg12: memref<8x128xf32, #tpu.memory_space<vmem>>, %arg13: memref<8x32xf32, #tpu.memory_space<vmem>>) attributes {dimension_semantics = [#tpu.dimension_semantics<arbitrary>], iteration_bounds = array<i64: 1>, scalar_prefetch = 0 : i64, scratch_operands = 2 : i64, tpu.core_type = #tpu.core_type<tc>, window_params = [{transform_indices = @transform_0, window_bounds = array<i64: 8, 16>}, {pipeline_mode = #tpu.pipeline_mode<synchronous>, transform_indices = @transform_1, window_bounds = array<i64: 16, 128>}, {pipeline_mode = #tpu.pipeline_mode<synchronous>, transform_indices = @transform_2, window_bounds = array<i64: 32, 128>}, {pipeline_mode = #tpu.pipeline_mode<synchronous>, transform_indices = @transform_3, window_bounds = array<i64: 1, 128>}, {pipeline_mode = #tpu.pipeline_mode<synchronous>, transform_indices = @transform_4, window_bounds = array<i64: 1, 32>}, {pipeline_mode = #tpu.pipeline_mode<synchronous>, transform_indices = @transform_5, window_bounds = array<i64: 1, 32>}, {pipeline_mode = #tpu.pipeline_mode<synchronous>, transform_indices = @transform_6, window_bounds = array<i64: 32, 128>}, {pipeline_mode = #tpu.pipeline_mode<synchronous>, transform_indices = @transform_7, window_bounds = array<i64: 1, 128>}, {transform_indices = @transform_8, window_bounds = array<i64: 8, 128>}, {pipeline_mode = #tpu.pipeline_mode<synchronous>, transform_indices = @transform_9, window_bounds = array<i64: 1, 32>}, {pipeline_mode = #tpu.pipeline_mode<synchronous>, transform_indices = @transform_10, window_bounds = array<i64: 1, 32>}]} {
    %c0_i32 = arith.constant 0 : i32
    %0 = arith.cmpi eq, %arg0, %c0_i32 : i32
    %1 = arith.extui %0 : i1 to i32
    %c0_i32_0 = arith.constant 0 : i32
    %2 = arith.cmpi ne, %1, %c0_i32_0 : i32
    scf.if %2 {
      %c0_62 = arith.constant 0 : index
      %c0_63 = arith.constant 0 : index
      %201 = vector.load %arg5[%c0_62, %c0_63] : memref<1x32xf32, #tpu.memory_space<vmem>>, vector<1x32xf32>
      %c0_64 = arith.constant 0 : index
      %c0_65 = arith.constant 0 : index
      %202 = vector.load %arg10[%c0_64, %c0_65] : memref<1x32xf32, #tpu.memory_space<vmem>>, vector<1x32xf32>
      tpu.vector_store %arg10[%c0_64, %c0_65], %201 {strides = array<i32>} : memref<1x32xf32, #tpu.memory_space<vmem>>, vector<1x32xf32>,
      %c0_66 = arith.constant 0 : index
      %c0_67 = arith.constant 0 : index
      %203 = vector.load %arg6[%c0_66, %c0_67] : memref<1x32xf32, #tpu.memory_space<vmem>>, vector<1x32xf32>
      %c0_68 = arith.constant 0 : index
      %c0_69 = arith.constant 0 : index
      %204 = vector.load %arg11[%c0_68, %c0_69] : memref<1x32xf32, #tpu.memory_space<vmem>>, vector<1x32xf32>
      tpu.vector_store %arg11[%c0_68, %c0_69], %203 {strides = array<i32>} : memref<1x32xf32, #tpu.memory_space<vmem>>, vector<1x32xf32>,
    } else {
    }
    %c0 = arith.constant 0 : index
    %c0_1 = arith.constant 0 : index
    %3 = vector.load %arg1[%c0, %c0_1] : memref<8x16xf32, #tpu.memory_space<vmem>>, vector<8x16xf32>
    %c0_2 = arith.constant 0 : index
    %c0_3 = arith.constant 0 : index
    %4 = vector.load %arg2[%c0_2, %c0_3] : memref<16x128xf32, #tpu.memory_space<vmem>>, vector<16x128xf32>
    %cst = arith.constant dense<0.000000e+00> : vector<8x128xf32>
    %5 = tpu.matmul %3, %4, %cst {dimension_numbers = #tpu.dot_dimension_numbers<[1], [0], [0], [1], [0, 0, 1, 1], [], []>} : vector<8x16xf32>, vector<16x128xf32>, vector<8x128xf32> -> vector<8x128xf32>
    %c0_4 = arith.constant 0 : index
    %c0_5 = arith.constant 0 : index
    %6 = vector.load %arg4[%c0_4, %c0_5] : memref<1x128xf32, #tpu.memory_space<vmem>>, vector<1x128xf32>
    %7 = vector.broadcast %6 : vector<1x128xf32> to vector<8x128xf32>
    %8 = arith.addf %5, %7 : vector<8x128xf32>
    %c0_6 = arith.constant 0 : index
    %c0_7 = arith.constant 0 : index
    %9 = vector.load %arg12[%c0_6, %c0_7] : memref<8x128xf32, #tpu.memory_space<vmem>>, vector<8x128xf32>
    tpu.vector_store %arg12[%c0_6, %c0_7], %8 {strides = array<i32>} : memref<8x128xf32, #tpu.memory_space<vmem>>, vector<8x128xf32>,
    %c0_8 = arith.constant 0 : index
    %c0_9 = arith.constant 0 : index
    %10 = vector.load %arg3[%c0_8, %c0_9] : memref<32x128xf32, #tpu.memory_space<vmem>>, vector<32x128xf32>
    %c0_10 = arith.constant 0 : index
    %c0_11 = arith.constant 0 : index
    %11 = vector.load %arg10[%c0_10, %c0_11] : memref<1x32xf32, #tpu.memory_space<vmem>>, vector<1x32xf32>
    %c0_12 = arith.constant 0 : index
    %c0_13 = arith.constant 0 : index
    %12 = vector.load %arg11[%c0_12, %c0_13] : memref<1x32xf32, #tpu.memory_space<vmem>>, vector<1x32xf32>
    %c0_i32_14 = arith.constant 0 : i32
    %13 = arith.index_cast %c0_i32_14 : i32 to index
    %c0_15 = arith.constant 0 : index
    %14 = vector.load %arg12[%13, %c0_15] : memref<8x128xf32, #tpu.memory_space<vmem>>, vector<1x128xf32>
    %cst_16 = arith.constant dense<0.000000e+00> : vector<1x128xf32>
    %15 = tpu.matmul %11, %10, %cst_16 {dimension_numbers = #tpu.dot_dimension_numbers<[1], [0], [0], [1], [0, 0, 1, 1], [], []>} : vector<1x32xf32>, vector<32x128xf32>, vector<1x128xf32> -> vector<1x128xf32>
    %16 = arith.addf %14, %15 : vector<1x128xf32>
    %17 = arith.negf %16 : vector<1x128xf32>
    %18 = math.exp %17 : vector<1x128xf32>
    %cst_17 = arith.constant 1.000000e+00 : f32
    %19 = vector.broadcast %cst_17 : f32 to vector<1x128xf32>
    %20 = arith.addf %19, %18 : vector<1x128xf32>
    %21 = arith.divf %19, %20 : vector<1x128xf32>
    %22 = math.tanh %16 : vector<1x128xf32>
    %23 = vector.extract_strided_slice %21 {offsets = [0, 0], sizes = [1, 32], strides = [1, 1]} : vector<1x128xf32> to vector<1x32xf32>
    %24 = vector.extract_strided_slice %21 {offsets = [0, 32], sizes = [1, 32], strides = [1, 1]} : vector<1x128xf32> to vector<1x32xf32>
    %25 = vector.extract_strided_slice %22 {offsets = [0, 64], sizes = [1, 32], strides = [1, 1]} : vector<1x128xf32> to vector<1x32xf32>
    %26 = vector.extract_strided_slice %21 {offsets = [0, 96], sizes = [1, 32], strides = [1, 1]} : vector<1x128xf32> to vector<1x32xf32>
    %27 = arith.mulf %24, %12 : vector<1x32xf32>
    %28 = arith.mulf %23, %25 : vector<1x32xf32>
    %29 = arith.addf %27, %28 : vector<1x32xf32>
    %30 = math.tanh %29 : vector<1x32xf32>
    %31 = arith.mulf %26, %30 : vector<1x32xf32>
    %32 = arith.index_cast %c0_i32_14 : i32 to index
    %c0_18 = arith.constant 0 : index
    %33 = vector.load %arg13[%32, %c0_18] : memref<8x32xf32, #tpu.memory_space<vmem>>, vector<1x32xf32>
    tpu.vector_store %arg13[%32, %c0_18], %31 {strides = array<i32>} : memref<8x32xf32, #tpu.memory_space<vmem>>, vector<1x32xf32>,
    %c1_i32 = arith.constant 1 : i32
    %34 = arith.index_cast %c1_i32 : i32 to index
    %c0_19 = arith.constant 0 : index
    %35 = vector.load %arg12[%34, %c0_19] : memref<8x128xf32, #tpu.memory_space<vmem>>, vector<1x128xf32>
    %cst_20 = arith.constant dense<0.000000e+00> : vector<1x128xf32>
    %36 = tpu.matmul %31, %10, %cst_20 {dimension_numbers = #tpu.dot_dimension_numbers<[1], [0], [0], [1], [0, 0, 1, 1], [], []>} : vector<1x32xf32>, vector<32x128xf32>, vector<1x128xf32> -> vector<1x128xf32>
    %37 = arith.addf %35, %36 : vector<1x128xf32>
    %38 = arith.negf %37 : vector<1x128xf32>
    %39 = math.exp %38 : vector<1x128xf32>
    %cst_21 = arith.constant 1.000000e+00 : f32
    %40 = vector.broadcast %cst_21 : f32 to vector<1x128xf32>
    %41 = arith.addf %40, %39 : vector<1x128xf32>
    %42 = arith.divf %40, %41 : vector<1x128xf32>
    %43 = math.tanh %37 : vector<1x128xf32>
    %44 = vector.extract_strided_slice %42 {offsets = [0, 0], sizes = [1, 32], strides = [1, 1]} : vector<1x128xf32> to vector<1x32xf32>
    %45 = vector.extract_strided_slice %42 {offsets = [0, 32], sizes = [1, 32], strides = [1, 1]} : vector<1x128xf32> to vector<1x32xf32>
    %46 = vector.extract_strided_slice %43 {offsets = [0, 64], sizes = [1, 32], strides = [1, 1]} : vector<1x128xf32> to vector<1x32xf32>
    %47 = vector.extract_strided_slice %42 {offsets = [0, 96], sizes = [1, 32], strides = [1, 1]} : vector<1x128xf32> to vector<1x32xf32>
    %48 = arith.mulf %45, %29 : vector<1x32xf32>
    %49 = arith.mulf %44, %46 : vector<1x32xf32>
    %50 = arith.addf %48, %49 : vector<1x32xf32>
    %51 = math.tanh %50 : vector<1x32xf32>
    %52 = arith.mulf %47, %51 : vector<1x32xf32>
    %53 = arith.index_cast %c1_i32 : i32 to index
    %c0_22 = arith.constant 0 : index
    %54 = vector.load %arg13[%53, %c0_22] : memref<8x32xf32, #tpu.memory_space<vmem>>, vector<1x32xf32>
    tpu.vector_store %arg13[%53, %c0_22], %52 {strides = array<i32>} : memref<8x32xf32, #tpu.memory_space<vmem>>, vector<1x32xf32>,
    %c2_i32 = arith.constant 2 : i32
    %55 = arith.index_cast %c2_i32 : i32 to index
    %c0_23 = arith.constant 0 : index
    %56 = vector.load %arg12[%55, %c0_23] : memref<8x128xf32, #tpu.memory_space<vmem>>, vector<1x128xf32>
    %cst_24 = arith.constant dense<0.000000e+00> : vector<1x128xf32>
    %57 = tpu.matmul %52, %10, %cst_24 {dimension_numbers = #tpu.dot_dimension_numbers<[1], [0], [0], [1], [0, 0, 1, 1], [], []>} : vector<1x32xf32>, vector<32x128xf32>, vector<1x128xf32> -> vector<1x128xf32>
    %58 = arith.addf %56, %57 : vector<1x128xf32>
    %59 = arith.negf %58 : vector<1x128xf32>
    %60 = math.exp %59 : vector<1x128xf32>
    %cst_25 = arith.constant 1.000000e+00 : f32
    %61 = vector.broadcast %cst_25 : f32 to vector<1x128xf32>
    %62 = arith.addf %61, %60 : vector<1x128xf32>
    %63 = arith.divf %61, %62 : vector<1x128xf32>
    %64 = math.tanh %58 : vector<1x128xf32>
    %65 = vector.extract_strided_slice %63 {offsets = [0, 0], sizes = [1, 32], strides = [1, 1]} : vector<1x128xf32> to vector<1x32xf32>
    %66 = vector.extract_strided_slice %63 {offsets = [0, 32], sizes = [1, 32], strides = [1, 1]} : vector<1x128xf32> to vector<1x32xf32>
    %67 = vector.extract_strided_slice %64 {offsets = [0, 64], sizes = [1, 32], strides = [1, 1]} : vector<1x128xf32> to vector<1x32xf32>
    %68 = vector.extract_strided_slice %63 {offsets = [0, 96], sizes = [1, 32], strides = [1, 1]} : vector<1x128xf32> to vector<1x32xf32>
    %69 = arith.mulf %66, %50 : vector<1x32xf32>
    %70 = arith.mulf %65, %67 : vector<1x32xf32>
    %71 = arith.addf %69, %70 : vector<1x32xf32>
    %72 = math.tanh %71 : vector<1x32xf32>
    %73 = arith.mulf %68, %72 : vector<1x32xf32>
    %74 = arith.index_cast %c2_i32 : i32 to index
    %c0_26 = arith.constant 0 : index
    %75 = vector.load %arg13[%74, %c0_26] : memref<8x32xf32, #tpu.memory_space<vmem>>, vector<1x32xf32>
    tpu.vector_store %arg13[%74, %c0_26], %73 {strides = array<i32>} : memref<8x32xf32, #tpu.memory_space<vmem>>, vector<1x32xf32>,
    %c3_i32 = arith.constant 3 : i32
    %76 = arith.index_cast %c3_i32 : i32 to index
    %c0_27 = arith.constant 0 : index
    %77 = vector.load %arg12[%76, %c0_27] : memref<8x128xf32, #tpu.memory_space<vmem>>, vector<1x128xf32>
    %cst_28 = arith.constant dense<0.000000e+00> : vector<1x128xf32>
    %78 = tpu.matmul %73, %10, %cst_28 {dimension_numbers = #tpu.dot_dimension_numbers<[1], [0], [0], [1], [0, 0, 1, 1], [], []>} : vector<1x32xf32>, vector<32x128xf32>, vector<1x128xf32> -> vector<1x128xf32>
    %79 = arith.addf %77, %78 : vector<1x128xf32>
    %80 = arith.negf %79 : vector<1x128xf32>
    %81 = math.exp %80 : vector<1x128xf32>
    %cst_29 = arith.constant 1.000000e+00 : f32
    %82 = vector.broadcast %cst_29 : f32 to vector<1x128xf32>
    %83 = arith.addf %82, %81 : vector<1x128xf32>
    %84 = arith.divf %82, %83 : vector<1x128xf32>
    %85 = math.tanh %79 : vector<1x128xf32>
    %86 = vector.extract_strided_slice %84 {offsets = [0, 0], sizes = [1, 32], strides = [1, 1]} : vector<1x128xf32> to vector<1x32xf32>
    %87 = vector.extract_strided_slice %84 {offsets = [0, 32], sizes = [1, 32], strides = [1, 1]} : vector<1x128xf32> to vector<1x32xf32>
    %88 = vector.extract_strided_slice %85 {offsets = [0, 64], sizes = [1, 32], strides = [1, 1]} : vector<1x128xf32> to vector<1x32xf32>
    %89 = vector.extract_strided_slice %84 {offsets = [0, 96], sizes = [1, 32], strides = [1, 1]} : vector<1x128xf32> to vector<1x32xf32>
    %90 = arith.mulf %87, %71 : vector<1x32xf32>
    %91 = arith.mulf %86, %88 : vector<1x32xf32>
    %92 = arith.addf %90, %91 : vector<1x32xf32>
    %93 = math.tanh %92 : vector<1x32xf32>
    %94 = arith.mulf %89, %93 : vector<1x32xf32>
    %95 = arith.index_cast %c3_i32 : i32 to index
    %c0_30 = arith.constant 0 : index
    %96 = vector.load %arg13[%95, %c0_30] : memref<8x32xf32, #tpu.memory_space<vmem>>, vector<1x32xf32>
    tpu.vector_store %arg13[%95, %c0_30], %94 {strides = array<i32>} : memref<8x32xf32, #tpu.memory_space<vmem>>, vector<1x32xf32>,
    %c4_i32 = arith.constant 4 : i32
    %97 = arith.index_cast %c4_i32 : i32 to index
    %c0_31 = arith.constant 0 : index
    %98 = vector.load %arg12[%97, %c0_31] : memref<8x128xf32, #tpu.memory_space<vmem>>, vector<1x128xf32>
    %cst_32 = arith.constant dense<0.000000e+00> : vector<1x128xf32>
    %99 = tpu.matmul %94, %10, %cst_32 {dimension_numbers = #tpu.dot_dimension_numbers<[1], [0], [0], [1], [0, 0, 1, 1], [], []>} : vector<1x32xf32>, vector<32x128xf32>, vector<1x128xf32> -> vector<1x128xf32>
    %100 = arith.addf %98, %99 : vector<1x128xf32>
    %101 = arith.negf %100 : vector<1x128xf32>
    %102 = math.exp %101 : vector<1x128xf32>
    %cst_33 = arith.constant 1.000000e+00 : f32
    %103 = vector.broadcast %cst_33 : f32 to vector<1x128xf32>
    %104 = arith.addf %103, %102 : vector<1x128xf32>
    %105 = arith.divf %103, %104 : vector<1x128xf32>
    %106 = math.tanh %100 : vector<1x128xf32>
    %107 = vector.extract_strided_slice %105 {offsets = [0, 0], sizes = [1, 32], strides = [1, 1]} : vector<1x128xf32> to vector<1x32xf32>
    %108 = vector.extract_strided_slice %105 {offsets = [0, 32], sizes = [1, 32], strides = [1, 1]} : vector<1x128xf32> to vector<1x32xf32>
    %109 = vector.extract_strided_slice %106 {offsets = [0, 64], sizes = [1, 32], strides = [1, 1]} : vector<1x128xf32> to vector<1x32xf32>
    %110 = vector.extract_strided_slice %105 {offsets = [0, 96], sizes = [1, 32], strides = [1, 1]} : vector<1x128xf32> to vector<1x32xf32>
    %111 = arith.mulf %108, %92 : vector<1x32xf32>
    %112 = arith.mulf %107, %109 : vector<1x32xf32>
    %113 = arith.addf %111, %112 : vector<1x32xf32>
    %114 = math.tanh %113 : vector<1x32xf32>
    %115 = arith.mulf %110, %114 : vector<1x32xf32>
    %116 = arith.index_cast %c4_i32 : i32 to index
    %c0_34 = arith.constant 0 : index
    %117 = vector.load %arg13[%116, %c0_34] : memref<8x32xf32, #tpu.memory_space<vmem>>, vector<1x32xf32>
    tpu.vector_store %arg13[%116, %c0_34], %115 {strides = array<i32>} : memref<8x32xf32, #tpu.memory_space<vmem>>, vector<1x32xf32>,
    %c5_i32 = arith.constant 5 : i32
    %118 = arith.index_cast %c5_i32 : i32 to index
    %c0_35 = arith.constant 0 : index
    %119 = vector.load %arg12[%118, %c0_35] : memref<8x128xf32, #tpu.memory_space<vmem>>, vector<1x128xf32>
    %cst_36 = arith.constant dense<0.000000e+00> : vector<1x128xf32>
    %120 = tpu.matmul %115, %10, %cst_36 {dimension_numbers = #tpu.dot_dimension_numbers<[1], [0], [0], [1], [0, 0, 1, 1], [], []>} : vector<1x32xf32>, vector<32x128xf32>, vector<1x128xf32> -> vector<1x128xf32>
    %121 = arith.addf %119, %120 : vector<1x128xf32>
    %122 = arith.negf %121 : vector<1x128xf32>
    %123 = math.exp %122 : vector<1x128xf32>
    %cst_37 = arith.constant 1.000000e+00 : f32
    %124 = vector.broadcast %cst_37 : f32 to vector<1x128xf32>
    %125 = arith.addf %124, %123 : vector<1x128xf32>
    %126 = arith.divf %124, %125 : vector<1x128xf32>
    %127 = math.tanh %121 : vector<1x128xf32>
    %128 = vector.extract_strided_slice %126 {offsets = [0, 0], sizes = [1, 32], strides = [1, 1]} : vector<1x128xf32> to vector<1x32xf32>
    %129 = vector.extract_strided_slice %126 {offsets = [0, 32], sizes = [1, 32], strides = [1, 1]} : vector<1x128xf32> to vector<1x32xf32>
    %130 = vector.extract_strided_slice %127 {offsets = [0, 64], sizes = [1, 32], strides = [1, 1]} : vector<1x128xf32> to vector<1x32xf32>
    %131 = vector.extract_strided_slice %126 {offsets = [0, 96], sizes = [1, 32], strides = [1, 1]} : vector<1x128xf32> to vector<1x32xf32>
    %132 = arith.mulf %129, %113 : vector<1x32xf32>
    %133 = arith.mulf %128, %130 : vector<1x32xf32>
    %134 = arith.addf %132, %133 : vector<1x32xf32>
    %135 = math.tanh %134 : vector<1x32xf32>
    %136 = arith.mulf %131, %135 : vector<1x32xf32>
    %137 = arith.index_cast %c5_i32 : i32 to index
    %c0_38 = arith.constant 0 : index
    %138 = vector.load %arg13[%137, %c0_38] : memref<8x32xf32, #tpu.memory_space<vmem>>, vector<1x32xf32>
    tpu.vector_store %arg13[%137, %c0_38], %136 {strides = array<i32>} : memref<8x32xf32, #tpu.memory_space<vmem>>, vector<1x32xf32>,
    %c6_i32 = arith.constant 6 : i32
    %139 = arith.index_cast %c6_i32 : i32 to index
    %c0_39 = arith.constant 0 : index
    %140 = vector.load %arg12[%139, %c0_39] : memref<8x128xf32, #tpu.memory_space<vmem>>, vector<1x128xf32>
    %cst_40 = arith.constant dense<0.000000e+00> : vector<1x128xf32>
    %141 = tpu.matmul %136, %10, %cst_40 {dimension_numbers = #tpu.dot_dimension_numbers<[1], [0], [0], [1], [0, 0, 1, 1], [], []>} : vector<1x32xf32>, vector<32x128xf32>, vector<1x128xf32> -> vector<1x128xf32>
    %142 = arith.addf %140, %141 : vector<1x128xf32>
    %143 = arith.negf %142 : vector<1x128xf32>
    %144 = math.exp %143 : vector<1x128xf32>
    %cst_41 = arith.constant 1.000000e+00 : f32
    %145 = vector.broadcast %cst_41 : f32 to vector<1x128xf32>
    %146 = arith.addf %145, %144 : vector<1x128xf32>
    %147 = arith.divf %145, %146 : vector<1x128xf32>
    %148 = math.tanh %142 : vector<1x128xf32>
    %149 = vector.extract_strided_slice %147 {offsets = [0, 0], sizes = [1, 32], strides = [1, 1]} : vector<1x128xf32> to vector<1x32xf32>
    %150 = vector.extract_strided_slice %147 {offsets = [0, 32], sizes = [1, 32], strides = [1, 1]} : vector<1x128xf32> to vector<1x32xf32>
    %151 = vector.extract_strided_slice %148 {offsets = [0, 64], sizes = [1, 32], strides = [1, 1]} : vector<1x128xf32> to vector<1x32xf32>
    %152 = vector.extract_strided_slice %147 {offsets = [0, 96], sizes = [1, 32], strides = [1, 1]} : vector<1x128xf32> to vector<1x32xf32>
    %153 = arith.mulf %150, %134 : vector<1x32xf32>
    %154 = arith.mulf %149, %151 : vector<1x32xf32>
    %155 = arith.addf %153, %154 : vector<1x32xf32>
    %156 = math.tanh %155 : vector<1x32xf32>
    %157 = arith.mulf %152, %156 : vector<1x32xf32>
    %158 = arith.index_cast %c6_i32 : i32 to index
    %c0_42 = arith.constant 0 : index
    %159 = vector.load %arg13[%158, %c0_42] : memref<8x32xf32, #tpu.memory_space<vmem>>, vector<1x32xf32>
    tpu.vector_store %arg13[%158, %c0_42], %157 {strides = array<i32>} : memref<8x32xf32, #tpu.memory_space<vmem>>, vector<1x32xf32>,
    %c7_i32 = arith.constant 7 : i32
    %160 = arith.index_cast %c7_i32 : i32 to index
    %c0_43 = arith.constant 0 : index
    %161 = vector.load %arg12[%160, %c0_43] : memref<8x128xf32, #tpu.memory_space<vmem>>, vector<1x128xf32>
    %cst_44 = arith.constant dense<0.000000e+00> : vector<1x128xf32>
    %162 = tpu.matmul %157, %10, %cst_44 {dimension_numbers = #tpu.dot_dimension_numbers<[1], [0], [0], [1], [0, 0, 1, 1], [], []>} : vector<1x32xf32>, vector<32x128xf32>, vector<1x128xf32> -> vector<1x128xf32>
    %163 = arith.addf %161, %162 : vector<1x128xf32>
    %164 = arith.negf %163 : vector<1x128xf32>
    %165 = math.exp %164 : vector<1x128xf32>
    %cst_45 = arith.constant 1.000000e+00 : f32
    %166 = vector.broadcast %cst_45 : f32 to vector<1x128xf32>
    %167 = arith.addf %166, %165 : vector<1x128xf32>
    %168 = arith.divf %166, %167 : vector<1x128xf32>
    %169 = math.tanh %163 : vector<1x128xf32>
    %170 = vector.extract_strided_slice %168 {offsets = [0, 0], sizes = [1, 32], strides = [1, 1]} : vector<1x128xf32> to vector<1x32xf32>
    %171 = vector.extract_strided_slice %168 {offsets = [0, 32], sizes = [1, 32], strides = [1, 1]} : vector<1x128xf32> to vector<1x32xf32>
    %172 = vector.extract_strided_slice %169 {offsets = [0, 64], sizes = [1, 32], strides = [1, 1]} : vector<1x128xf32> to vector<1x32xf32>
    %173 = vector.extract_strided_slice %168 {offsets = [0, 96], sizes = [1, 32], strides = [1, 1]} : vector<1x128xf32> to vector<1x32xf32>
    %174 = arith.mulf %171, %155 : vector<1x32xf32>
    %175 = arith.mulf %170, %172 : vector<1x32xf32>
    %176 = arith.addf %174, %175 : vector<1x32xf32>
    %177 = math.tanh %176 : vector<1x32xf32>
    %178 = arith.mulf %173, %177 : vector<1x32xf32>
    %179 = arith.index_cast %c7_i32 : i32 to index
    %c0_46 = arith.constant 0 : index
    %180 = vector.load %arg13[%179, %c0_46] : memref<8x32xf32, #tpu.memory_space<vmem>>, vector<1x32xf32>
    tpu.vector_store %arg13[%179, %c0_46], %178 {strides = array<i32>} : memref<8x32xf32, #tpu.memory_space<vmem>>, vector<1x32xf32>,
    %c8_i32 = arith.constant 8 : i32
    %c0_47 = arith.constant 0 : index
    %c0_48 = arith.constant 0 : index
    %181 = vector.load %arg10[%c0_47, %c0_48] : memref<1x32xf32, #tpu.memory_space<vmem>>, vector<1x32xf32>
    tpu.vector_store %arg10[%c0_47, %c0_48], %178 {strides = array<i32>} : memref<1x32xf32, #tpu.memory_space<vmem>>, vector<1x32xf32>,
    %c0_49 = arith.constant 0 : index
    %c0_50 = arith.constant 0 : index
    %182 = vector.load %arg11[%c0_49, %c0_50] : memref<1x32xf32, #tpu.memory_space<vmem>>, vector<1x32xf32>
    tpu.vector_store %arg11[%c0_49, %c0_50], %176 {strides = array<i32>} : memref<1x32xf32, #tpu.memory_space<vmem>>, vector<1x32xf32>,
    %c0_51 = arith.constant 0 : index
    %c0_52 = arith.constant 0 : index
    %183 = vector.load %arg13[%c0_51, %c0_52] : memref<8x32xf32, #tpu.memory_space<vmem>>, vector<8x32xf32>
    %c0_53 = arith.constant 0 : index
    %c0_54 = arith.constant 0 : index
    %184 = vector.load %arg7[%c0_53, %c0_54] : memref<32x128xf32, #tpu.memory_space<vmem>>, vector<32x128xf32>
    %cst_55 = arith.constant dense<0.000000e+00> : vector<8x128xf32>
    %185 = tpu.matmul %183, %184, %cst_55 {dimension_numbers = #tpu.dot_dimension_numbers<[1], [0], [0], [1], [0, 0, 1, 1], [], []>} : vector<8x32xf32>, vector<32x128xf32>, vector<8x128xf32> -> vector<8x128xf32>
    %c0_56 = arith.constant 0 : index
    %c0_57 = arith.constant 0 : index
    %186 = vector.load %arg8[%c0_56, %c0_57] : memref<1x128xf32, #tpu.memory_space<vmem>>, vector<1x128xf32>
    %187 = vector.broadcast %186 : vector<1x128xf32> to vector<8x128xf32>
    %188 = arith.addf %185, %187 : vector<8x128xf32>
    %cst_58 = arith.constant dense<0xFF800000> : vector<8xf32>
    %189 = vector.multi_reduction <maximumf>, %188, %cst_58 [1] : vector<8x128xf32> to vector<8xf32>
    %190 = vector.shape_cast %189 : vector<8xf32> to vector<8x1xf32>
    %191 = vector.broadcast %190 : vector<8x1xf32> to vector<8x128xf32>
    %192 = arith.subf %188, %191 : vector<8x128xf32>
    %193 = math.exp %192 : vector<8x128xf32>
    %cst_59 = arith.constant dense<0.000000e+00> : vector<8xf32>
    %194 = vector.multi_reduction <add>, %193, %cst_59 [1] : vector<8x128xf32> to vector<8xf32>
    %195 = vector.shape_cast %194 : vector<8xf32> to vector<8x1xf32>
    %196 = math.log %195 : vector<8x1xf32>
    %197 = arith.addf %190, %196 : vector<8x1xf32>
    %198 = vector.broadcast %197 : vector<8x1xf32> to vector<8x128xf32>
    %199 = arith.subf %188, %198 : vector<8x128xf32>
    %c0_60 = arith.constant 0 : index
    %c0_61 = arith.constant 0 : index
    %200 = vector.load %arg9[%c0_60, %c0_61] : memref<8x128xf32, #tpu.memory_space<vmem>>, vector<8x128xf32>
    tpu.vector_store %arg9[%c0_60, %c0_61], %199 {strides = array<i32>} : memref<8x128xf32, #tpu.memory_space<vmem>>, vector<8x128xf32>,
    return
  }
  func.func @transform_0(%arg0: i32) -> (i32, i32) {
    %c0_i32 = arith.constant 0 : i32
    %c0_i32_0 = arith.constant 0 : i32
    return %arg0, %c0_i32 : i32, i32
  }
  func.func @transform_1(%arg0: i32) -> (i32, i32) {
    %c0_i32 = arith.constant 0 : i32
    %c0_i32_0 = arith.constant 0 : i32
    %c0_i32_1 = arith.constant 0 : i32
    return %c0_i32, %c0_i32_0 : i32, i32
  }
  func.func @transform_2(%arg0: i32) -> (i32, i32) {
    %c0_i32 = arith.constant 0 : i32
    %c0_i32_0 = arith.constant 0 : i32
    %c0_i32_1 = arith.constant 0 : i32
    return %c0_i32, %c0_i32_0 : i32, i32
  }
  func.func @transform_3(%arg0: i32) -> (i32, i32) {
    %c0_i32 = arith.constant 0 : i32
    %c0_i32_0 = arith.constant 0 : i32
    %c0_i32_1 = arith.constant 0 : i32
    return %c0_i32, %c0_i32_0 : i32, i32
  }
  func.func @transform_4(%arg0: i32) -> (i32, i32) {
    %c0_i32 = arith.constant 0 : i32
    %c0_i32_0 = arith.constant 0 : i32
    %c0_i32_1 = arith.constant 0 : i32
    return %c0_i32, %c0_i32_0 : i32, i32
  }
  func.func @transform_5(%arg0: i32) -> (i32, i32) {
    %c0_i32 = arith.constant 0 : i32
    %c0_i32_0 = arith.constant 0 : i32
    %c0_i32_1 = arith.constant 0 : i32
    return %c0_i32, %c0_i32_0 : i32, i32
  }
  func.func @transform_6(%arg0: i32) -> (i32, i32) {
    %c0_i32 = arith.constant 0 : i32
    %c0_i32_0 = arith.constant 0 : i32
    %c0_i32_1 = arith.constant 0 : i32
    return %c0_i32, %c0_i32_0 : i32, i32
  }
  func.func @transform_7(%arg0: i32) -> (i32, i32) {
    %c0_i32 = arith.constant 0 : i32
    %c0_i32_0 = arith.constant 0 : i32
    %c0_i32_1 = arith.constant 0 : i32
    return %c0_i32, %c0_i32_0 : i32, i32
  }
  func.func @transform_8(%arg0: i32) -> (i32, i32) {
    %c0_i32 = arith.constant 0 : i32
    %c0_i32_0 = arith.constant 0 : i32
    return %arg0, %c0_i32 : i32, i32
  }
  func.func @transform_9(%arg0: i32) -> (i32, i32) {
    %c0_i32 = arith.constant 0 : i32
    %c0_i32_0 = arith.constant 0 : i32
    %c0_i32_1 = arith.constant 0 : i32
    return %c0_i32, %c0_i32_0 : i32, i32
  }
  func.func @transform_10(%arg0: i32) -> (i32, i32) {
    %c0_i32 = arith.constant 0 : i32
    %c0_i32_0 = arith.constant 0 : i32
    %c0_i32_1 = arith.constant 0 : i32
    return %c0_i32, %c0_i32_0 : i32, i32
  }
}

</mosaic_0001>

<bundles_post_ra>
// kernel: tpu_custom_call.1
= control target key start
LH: loop header
LB: loop body
LE: loop exit
PB: predicated region body
PF: predicated region fallthrough
CT: control target
= control target key end

     0   :  { %16 = vsyncpa [#allocation5], 0  ;;  %s1936_s0 = inlined_call_operand.hbm [shape: f32[8,16], index: 0, kind: input, shape index: {}]   ;;  %s1937_s1 = inlined_call_operand.hbm [shape: f32[16,128], index: 1, kind: input, shape index: {}]   ;;  %s1938_s2 = inlined_call_operand.hbm [shape: f32[32,128], index: 2, kind: input, shape index: {}]   ;;  %s1939_s3 = inlined_call_operand.vmem [shape: f32[1,128], index: 3, kind: input, shape index: {}]   ;;  %s1940_s4 = inlined_call_operand.vmem [shape: f32[1,32], index: 4, kind: input, shape index: {}]   ;;  %s1941_s5 = inlined_call_operand.vmem [shape: f32[1,32], index: 5, kind: input, shape index: {}]   ;;  %s1942_s6 = inlined_call_operand.hbm [shape: f32[32,128], index: 6, kind: input, shape index: {}]   ;;  %s1943_s7 = inlined_call_operand.vmem [shape: f32[1,128], index: 7, kind: input, shape index: {}]   ;;  %s1944_s8 = inlined_call_operand.hbm [shape: f32[8,128], index: 8, kind: output, shape index: {0}]   ;;  %s1945_s9 = inlined_call_operand.hbm [shape: f32[1,32], index: 9, kind: output, shape index: {1}]   ;;  %s1946_s10 = inlined_call_operand.hbm [shape: f32[1,32], index: 10, kind: output, shape index: {2}]  }
   0x1   :  { %17 = vsyncpa [#allocation8], 0 }
   0x2   :  { %18 = vsyncpa [#allocation11], 0 }
   0x3   :  { %19 = vsyncpa [#allocation6], 0 }
   0x4   :  { %20 = vsyncpa [#allocation14], 0  ;;  %s1648_s13 = smov [#allocation7]   ;;  %s1484_s17 = scalar_lea.hbm %s1937_s1, 256 }
   0x5   :  { %s36_s14 = sshll.u32 %s1648_s13, 4  ;;  %p1485_p0 = scmp.ne.s32.totalorder %s1937_s1, %s1484_s17  ;;  %s37_s14 = int_to_ptr.vmem [resolvable:$true] %s36_s14 }
   0x6   :  { %p1488_p1 = scmp.lt.u32.totalorder %s1484_s17, %s1937_s1 }
   0x8   :  { %p1490_p2 = pnand %p1488_p1, %p1485_p0 }
   0xa   :  { %1493 = shalt.err (!%p1490_p2)
}
   0xb   :  { %s1494_s22 = scalar_lea.vmem %s37_s14, 256  ;;  %p1499_p4 = scmp.lt.s32.totalorder %s37_s14, %s37_s14 }
   0xc   :  { %p1495_p3 = scmp.ne.s32.totalorder %s37_s14, %s1494_s22  ;;  %p1500_p5 = scmp.lt.s32.totalorder %s1494_s22, %s1494_s22 }
   0xe   :  { %p1501_p6 = por %p1500_p5, %p1499_p4 }
  0x10   :  { %p1502_p7 = pnand %p1501_p6, %p1495_p3 }
  0x12   :  { %1505 = shalt.err (!%p1502_p7)
}
  0x13   :  { %s1649_s23 = smov 128   ;;  %s1650_s24 = smov 8  }
  0x14   :  { %42 = dma.hbm_to_vmem [thread:$0]  %s1937_s1, 256, %s37_s14, [#allocation8], %s1649_s23, %s1649_s23, %s1650_s24  }
  0x15   :  { %s1651_s27 = smov [#allocation4]   ;;  %s1652_s29 = smov [#allocation9]  }
  0x16   :  { %s27_s28 = sshll.u32 %s1651_s27, 4  ;;  %s48_s30 = sshll.u32 %s1652_s29, 4  ;;  %s28_s28 = int_to_ptr.vmem [resolvable:$true] %s27_s28  ;;  %s49_s30 = int_to_ptr.vmem [resolvable:$true] %s48_s30 }
  0x17   :  { %s1506_s13 = scalar_lea.hbm %s1936_s0, 128 }
  0x18   :  { %p1507_p8 = scmp.ne.s32.totalorder %s1936_s0, %s1506_s13  ;;  %p1510_p9 = scmp.lt.u32.totalorder %s1506_s13, %s1936_s0 }
  0x1a   :  { %p1512_p10 = pnand %p1510_p9, %p1507_p8 }
  0x1c   :  { %1515 = shalt.err (!%p1512_p10)
}
  0x1d   :  { %s1516_s1 = scalar_lea.vmem %s28_s28, 128  ;;  %p1521_p12 = scmp.lt.s32.totalorder %s28_s28, %s28_s28 }
  0x1e   :  { %p1517_p11 = scmp.ne.s32.totalorder %s28_s28, %s1516_s1  ;;  %p1522_p13 = scmp.lt.s32.totalorder %s1516_s1, %s1516_s1 }
  0x20   :  { %p1523_p0 = por %p1522_p13, %p1521_p12 }
  0x22   :  { %p1524_p1 = pnand %p1523_p0, %p1517_p11 }
  0x24   :  { %1527 = shalt.err (!%p1524_p1)
}
  0x25   :  { %30 = dma.hbm_to_vmem [thread:$0]  %s1936_s0, 128, %s28_s28, [#allocation5]  }
  0x26   :  { %s1528_s22 = scalar_lea.hbm %s1938_s2, 512 }
  0x27   :  { %p1529_p2 = scmp.ne.s32.totalorder %s1938_s2, %s1528_s22  ;;  %p1532_p3 = scmp.lt.u32.totalorder %s1528_s22, %s1938_s2 }
  0x29   :  { %p1534_p4 = pnand %p1532_p3, %p1529_p2 }
  0x2b   :  { %1537 = shalt.err (!%p1534_p4)
}
  0x2c   :  { %s1538_s11 = scalar_lea.vmem %s49_s30, 512  ;;  %p1543_p6 = scmp.lt.s32.totalorder %s49_s30, %s49_s30 }
  0x2d   :  { %p1539_p5 = scmp.ne.s32.totalorder %s49_s30, %s1538_s11  ;;  %p1544_p7 = scmp.lt.s32.totalorder %s1538_s11, %s1538_s11 }
  0x2f   :  { %p1545_p8 = por %p1544_p7, %p1543_p6 }
  0x31   :  { %p1546_p9 = pnand %p1545_p8, %p1539_p5 }
  0x33   :  { %1549 = shalt.err (!%p1546_p9)
}
  0x34   :  { %54 = dma.hbm_to_vmem [thread:$0]  %s1938_s2, 512, %s49_s30, [#allocation8], %s1649_s23, %s1649_s23, %s1650_s24  }
  0x35   :  { %s1653_s12 = smov [#allocation10]   ;;  %s1550_s17 = scalar_lea.hbm %s1942_s6, 512 }
  0x36   :  { %s66_s13 = sshll.u32 %s1653_s12, 4  ;;  %p1551_p10 = scmp.ne.s32.totalorder %s1942_s6, %s1550_s17  ;;  %s67_s13 = int_to_ptr.vmem [resolvable:$true] %s66_s13 }
  0x37   :  { %p1554_p11 = scmp.lt.u32.totalorder %s1550_s17, %s1942_s6 }
  0x39   :  { %p1556_p12 = pnand %p1554_p11, %p1551_p10 }
  0x3b   :  { %1559 = shalt.err (!%p1556_p12)
}
  0x3c   :  { %s1560_s20 = scalar_lea.vmem %s67_s13, 512  ;;  %p1565_p0 = scmp.lt.s32.totalorder %s67_s13, %s67_s13 }
  0x3d   :  { %p1561_p13 = scmp.ne.s32.totalorder %s67_s13, %s1560_s20  ;;  %p1566_p1 = scmp.lt.s32.totalorder %s1560_s20, %s1560_s20 }
  0x3f   :  { %p1567_p2 = por %p1566_p1, %p1565_p0 }
  0x41   :  { %p1568_p3 = pnand %p1567_p2, %p1561_p13 }
  0x43   :  { %1571 = shalt.err (!%p1568_p3)
}
  0x44   :  { %72 = dma.hbm_to_vmem [thread:$0]  %s1942_s6, 512, %s67_s13, [#allocation11], %s1649_s23, %s1649_s23, %s1650_s24  }
  0x45   :  { %1638 = dma.done.wait [#allocation5], 128  }
  0x46   :  { %1639 = vsyncadd [#allocation5], 4294967168 }
  0x47   :  { %1640 = dma.done.wait [#allocation8], 768  }
  0x48   :  { %1641 = vsyncadd [#allocation8], 4294966528 }
  0x49   :  { %1642 = dma.done.wait [#allocation11], 512  }
  0x4a   :  { %1643 = vsyncadd [#allocation11], 4294966784  ;;  %v1654_v0 = vmov 0.0|0.0   ;;  %vm1655_vm0 = vmmov 0   ;;  %v1656_v1 = vmov 0.0   ;;  %v97_v2 = vld [vmem:[#allocation7] sm:$0xff] }
  0x4b   :  { %1344 = vmatprep.subr.bf16.mxu0 %v1654_v0  ;;  %1242 = vmatprep.mubr.msk.f32.mxu0 %vm1655_vm0, %v1656_v1  ;;  %v98_v3 = vld [vmem:[#allocation7 + $0x8] sm:$0xff]  ;;  %vm92_vm1 = vcmask 253952   ;;  %v181_v5 = vld [vmem:[#allocation9] sm:$0xff]  ;;  %v182_v6 = vld [vmem:[#allocation9 + $0x8] sm:$0xff]  ;;  %vm106_vm2 = vcmask 130048   ;;  %vm188_vm3 = vcmask 261120  }
  0x4c   :  { %1347 = vmatprep.subr.bf16.mxu1 %v1654_v0  ;;  %1253 = vmatprep.mubr.msk.f32.mxu1 %vm1655_vm0, %v1656_v1  ;;  %v1345_v4 = vpack.c.bf16 %v98_v3, %v97_v2  ;;  %v183_v7 = vld [vmem:[#allocation9 + $0x10] sm:$0xff]  ;;  %v1781_v8 = vpack.c.bf16 %v182_v6, %v181_v5  ;;  %v184_v9 = vld [vmem:[#allocation9 + $0x18] sm:$0xff]  ;;  %v96_v11 = vld [vmem:[#allocation4] sm:$0xff]  ;;  %s1657_s25 = smov 64   ;;  %s1659_s27 = smov 96  }
  0x4d   :  { %v91_v10 = vld [vmem:[%s1940_s4] sm:$0x1]  ;;  %v1788_v12 = vpack.c.bf16 %v184_v9, %v183_v7  ;;  %s1660_s29 = smov [#allocation13]  }
  0x4e   :  { %1346 = vmatpush3.bf16.msra.mxu0 %v1345_v4  ;;  %93 = vst.msk [vmem:[#allocation13] sm:$0x1] %vm92_vm1, %v91_v10  ;;  %1349 = vmatpush3.bf16.msra.mxu1 %v1781_v8  ;;  %v94_v14 = vld [vmem:[%s1941_s5] sm:$0x1]  ;;  %s1658_s5 = smov 32   ;;  %s1141_s11 = sshll.u32 %s1660_s29, 4  ;;  %s1142_s11 = int_to_ptr.vmem [resolvable:$true] %s1141_s11 }
  0x4f   :  { %1353 = vmatprep.subr.bf16.mxu0 %v1654_v0  ;;  %1350 = vmatprep.subr.bf16.mxu1 %v1654_v0  ;;  %95 = vst.msk [vmem:[#allocation15] sm:$0x1] %vm92_vm1, %v94_v14  ;;  %v1169_v15 = vld [vmem:[%s1939_s3] ss:$0 sm:$0xff]  ;;  %s1572_s0 = scalar_lea.vmem %s1142_s11, 16  ;;  %s1576_s28 = scalar_lea.vmem %s1142_s11, 32 }
  0x50   :  { %p1573_p4 = scmp.ne.s32.totalorder %s1142_s11, %s1572_s0  ;;  %p1577_p5 = scmp.lt.s32.totalorder %s1142_s11, %s1142_s11 }
  0x51   :  { %1243 = vmatmul.mubr.msk.f32.vlgmr.msra.gmra.mrb[0].mxu0 %vm106_vm2, %v96_v11  ;;  %p1578_p6 = scmp.lt.s32.totalorder %s1576_s28, %s1572_s0 }
  0x52   :  { %1355 = vmatpush3.bf16.msra.mxu0 %v1781_v8  ;;  %1264 = vmatprep.mubr.msk.f32.mxu0 %vm1655_vm0, %v1656_v1 }
  0x53   :  { %1352 = vmatpush3.bf16.msra.mxu1 %v1788_v12  ;;  %1356 = vmatprep.subr.bf16.mxu0 %v1654_v0  ;;  %p1579_p7 = por %p1578_p6, %p1577_p5 }
  0x54   :  { %1359 = vmatprep.subr.bf16.mxu1 %v1654_v0 }
  0x55   :  { %v185_v13 = vld [vmem:[#allocation13] sm:$0x1]  ;;  %p1580_p8 = pnand %p1579_p7, %p1573_p4 }
  0x56   :  { %1254 = vmatmul.mubr.msk.f32.vlgmr.msra.gmra.mrb[0].mxu1 %vm188_vm3, %v185_v13  ;;  %1358 = vmatpush3.bf16.msra.mxu0 %v1788_v12  ;;  %v1173_v24 = vld [vmem:[#allocation15] ss:$0 sm:$0xff] }
  0x57   :  { %1361 = vmatpush3.bf16.msra.mxu1 %v1781_v8  ;;  %1275 = vmatprep.mubr.msk.f32.mxu1 %vm1655_vm0, %v1656_v1 }
  0x58   :  { %1362 = vmatprep.subr.bf16.mxu1 %v1654_v0  ;;  %1365 = vmatprep.subr.bf16.mxu0 %v1654_v0 }
  0x5b   :  { %1364 = vmatpush3.bf16.msra.mxu1 %v1788_v12 }
  0x5c   :  { %1371 = vmatprep.subr.bf16.mxu1 %v1654_v0 }
 0x124   :  { %v176_v16 = vpop.f32.mrb[0].mxu0 }
 0x125   :  { %v177_v17 = vadd.f32 %v1169_v15, %v176_v16  ;;  %v1244_v18 = vpop.f32.mrb[1].mxu0 }
 0x127   :  { %180 = vst [vmem:[#allocation2] sm:$0xff] %v177_v17 }
 0x129   :  { %v258_v19 = vpop.f32.mrb[0].mxu1 }
 0x12a   :  { %v1255_v20 = vpop.f32.mrb[1].mxu1 }
 0x12e   :  { %v187_v21 = vld [vmem:[#allocation2] sm:$0x1]  ;;  %v301_v39 = vld [vmem:[#allocation2 + $0x1] sm:$0x1]  ;;  %v404_v57 = vld [vmem:[#allocation2 + $0x2] sm:$0x1] }
 0x12f   :  { %v262_v22 = vadd.f32 %v258_v19, %v187_v21  ;;  %v507_v15 = vld [vmem:[#allocation2 + $0x3] sm:$0x1] }
 0x131   :  { %1416 = vtanh.f32 %v262_v22  ;;  %v1172_v25 = vmul.f32 -1.442695, %v262_v22 }
 0x133   :  { %1418 = vpow2.f32 %v1172_v25 }
 0x13b   :  { %v1417_v23 = vpop.eup %1416 }
 0x13c   :  { %280 = vrot.lane.b32.xlu0 %v1417_v23, %s1657_s25 }
 0x13d   :  { %v1419_v26 = vpop.eup %1418 }
 0x13e   :  { %v266_v27 = vadd.f32 1.0, %v1419_v26 }
 0x140   :  { %275 = vrot.lane.b32.xlu0 %v1173_v24, %s1658_s5  ;;  %1420 = vrcp.f32 %v266_v27 }
 0x14a   :  { %v1421_v28 = vpop.eup %1420 }
 0x1ae   :  { %v281_v29 = vpop.permute.xlu0 %280 }
 0x1af   :  { %v283_v30 = vmul.f32 %v1421_v28, %v281_v29 }
 0x1b1   :  { %285 = vrot.lane.b32.xlu1 %v283_v30, %s1658_s5 }
 0x1b2   :  { %v276_v31 = vpop.permute.xlu0 %275 }
 0x1b3   :  { %v278_v32 = vmul.f32 %v1421_v28, %v276_v31 }
 0x223   :  { %v286_v33 = vpop.permute.xlu1 %285 }
 0x224   :  { %v288_v34 = vadd.f32 %v286_v33, %v278_v32  ;;  %v610_v33 = vld [vmem:[#allocation2 + $0x4] sm:$0x1] }
 0x226   :  { %1422 = vtanh.f32 %v288_v34 }
 0x230   :  { %v1423_v35 = vpop.eup %1422 }
 0x231   :  { %291 = vrot.lane.b32.xlu1 %v1423_v35, %s1657_s25 }
 0x2a3   :  { %v292_v36 = vpop.permute.xlu1 %291 }
 0x2a4   :  { %v294_v37 = vmul.f32 %v1421_v28, %v292_v36 }
 0x2a6   :  { %296 = vrot.lane.b32.xlu0 %v294_v37, %s1658_s5 }
 0x318   :  { %v297_v38 = vpop.permute.xlu0 %296 }
 0x319   :  { %300 = vst.msk [vmem:[#allocation3] sm:$0x1] %vm92_vm1, %v297_v38  ;;  %1265 = vmatmul.mubr.msk.f32.vlgmr.msra.gmra.mrb[2].mxu0 %vm188_vm3, %v297_v38 }
 0x31a   :  { %1367 = vmatpush3.bf16.msra.mxu0 %v1781_v8  ;;  %1286 = vmatprep.mubr.msk.f32.mxu0 %vm1655_vm0, %v1656_v1 }
 0x31b   :  { %1368 = vmatprep.subr.bf16.mxu0 %v1654_v0 }
 0x31e   :  { %1370 = vmatpush3.bf16.msra.mxu0 %v1788_v12 }
 0x31f   :  { %1377 = vmatprep.subr.bf16.mxu0 %v1654_v0 }
 0x3ec   :  { %v370_v40 = vpop.f32.mrb[2].mxu0 }
 0x3ed   :  { %v374_v41 = vadd.f32 %v370_v40, %v301_v39  ;;  %v1266_v42 = vpop.f32.mrb[3].mxu0 }
 0x3ef   :  { %1424 = vtanh.f32 %v374_v41  ;;  %v1175_v44 = vmul.f32 -1.442695, %v374_v41 }
 0x3f1   :  { %1426 = vpow2.f32 %v1175_v44 }
 0x3f9   :  { %v1425_v43 = vpop.eup %1424 }
 0x3fa   :  { %384 = vrot.lane.b32.xlu1 %v1425_v43, %s1657_s25 }
 0x3fb   :  { %v1427_v45 = vpop.eup %1426 }
 0x3fc   :  { %v378_v46 = vadd.f32 1.0, %v1427_v45 }
 0x3fe   :  { %1428 = vrcp.f32 %v378_v46 }
 0x408   :  { %v1429_v47 = vpop.eup %1428 }
 0x409   :  { %v382_v50 = vmul.f32 %v1429_v47, %v288_v34 }
 0x46c   :  { %v385_v48 = vpop.permute.xlu1 %384 }
 0x46d   :  { %v387_v49 = vmul.f32 %v1429_v47, %v385_v48 }
 0x46f   :  { %389 = vrot.lane.b32.xlu0 %v387_v49, %s1658_s5 }
 0x4e1   :  { %v390_v51 = vpop.permute.xlu0 %389 }
 0x4e2   :  { %v392_v52 = vadd.f32 %v390_v51, %v382_v50  ;;  %v713_v51 = vld [vmem:[#allocation2 + $0x5] sm:$0x1] }
 0x4e4   :  { %1430 = vtanh.f32 %v392_v52 }
 0x4ee   :  { %v1431_v53 = vpop.eup %1430 }
 0x4ef   :  { %395 = vrot.lane.b32.xlu1 %v1431_v53, %s1657_s25 }
 0x561   :  { %v396_v54 = vpop.permute.xlu1 %395 }
 0x562   :  { %v398_v55 = vmul.f32 %v1429_v47, %v396_v54 }
 0x564   :  { %400 = vrot.lane.b32.xlu0 %v398_v55, %s1658_s5 }
 0x5d6   :  { %v401_v56 = vpop.permute.xlu0 %400 }
 0x5d7   :  { %403 = vst.msk [vmem:[#allocation3 + $0x1] sm:$0x1] %vm92_vm1, %v401_v56  ;;  %1276 = vmatmul.mubr.msk.f32.vlgmr.msra.gmra.mrb[2].mxu1 %vm188_vm3, %v401_v56 }
 0x5d8   :  { %1373 = vmatpush3.bf16.msra.mxu1 %v1781_v8  ;;  %1297 = vmatprep.mubr.msk.f32.mxu1 %vm1655_vm0, %v1656_v1 }
 0x5d9   :  { %1374 = vmatprep.subr.bf16.mxu1 %v1654_v0 }
 0x5dc   :  { %1376 = vmatpush3.bf16.msra.mxu1 %v1788_v12 }
 0x5dd   :  { %1383 = vmatprep.subr.bf16.mxu1 %v1654_v0 }
 0x6aa   :  { %v473_v58 = vpop.f32.mrb[2].mxu1 }
 0x6ab   :  { %v477_v59 = vadd.f32 %v473_v58, %v404_v57  ;;  %v1277_v60 = vpop.f32.mrb[3].mxu1 }
 0x6ad   :  { %1432 = vtanh.f32 %v477_v59  ;;  %v1177_v62 = vmul.f32 -1.442695, %v477_v59 }
 0x6af   :  { %1434 = vpow2.f32 %v1177_v62 }
 0x6b7   :  { %v1433_v61 = vpop.eup %1432 }
 0x6b8   :  { %487 = vrot.lane.b32.xlu1 %v1433_v61, %s1657_s25 }
 0x6b9   :  { %v1435_v63 = vpop.eup %1434 }
 0x6ba   :  { %v481_v2 = vadd.f32 1.0, %v1435_v63 }
 0x6bc   :  { %1436 = vrcp.f32 %v481_v2 }
 0x6c6   :  { %v1437_v3 = vpop.eup %1436 }
 0x6c7   :  { %v485_v6 = vmul.f32 %v1437_v3, %v392_v52 }
 0x72a   :  { %v488_v4 = vpop.permute.xlu1 %487 }
 0x72b   :  { %v490_v5 = vmul.f32 %v1437_v3, %v488_v4 }
 0x72d   :  { %492 = vrot.lane.b32.xlu0 %v490_v5, %s1658_s5  ;;  %v816_v5 = vld [vmem:[#allocation2 + $0x6] sm:$0x1] }
 0x79f   :  { %v493_v7 = vpop.permute.xlu0 %492 }
 0x7a0   :  { %v495_v9 = vadd.f32 %v493_v7, %v485_v6 }
 0x7a2   :  { %1438 = vtanh.f32 %v495_v9 }
 0x7ac   :  { %v1439_v10 = vpop.eup %1438 }
 0x7ad   :  { %498 = vrot.lane.b32.xlu1 %v1439_v10, %s1657_s25 }
 0x81f   :  { %v499_v11 = vpop.permute.xlu1 %498 }
 0x820   :  { %v501_v13 = vmul.f32 %v1437_v3, %v499_v11 }
 0x822   :  { %503 = vrot.lane.b32.xlu0 %v501_v13, %s1658_s5 }
 0x894   :  { %v504_v14 = vpop.permute.xlu0 %503 }
 0x895   :  { %506 = vst.msk [vmem:[#allocation3 + $0x2] sm:$0x1] %vm92_vm1, %v504_v14  ;;  %1287 = vmatmul.mubr.msk.f32.vlgmr.msra.gmra.mrb[4].mxu0 %vm188_vm3, %v504_v14 }
 0x896   :  { %1379 = vmatpush3.bf16.msra.mxu0 %v1781_v8  ;;  %1308 = vmatprep.mubr.msk.f32.mxu0 %vm1655_vm0, %v1656_v1 }
 0x897   :  { %1380 = vmatprep.subr.bf16.mxu0 %v1654_v0 }
 0x89a   :  { %1382 = vmatpush3.bf16.msra.mxu0 %v1788_v12 }
 0x89b   :  { %1389 = vmatprep.subr.bf16.mxu0 %v1654_v0 }
 0x968   :  { %v576_v16 = vpop.f32.mrb[4].mxu0 }
 0x969   :  { %v580_v17 = vadd.f32 %v576_v16, %v507_v15  ;;  %v1288_v18 = vpop.f32.mrb[5].mxu0 }
 0x96b   :  { %1440 = vtanh.f32 %v580_v17  ;;  %v1179_v20 = vmul.f32 -1.442695, %v580_v17 }
 0x96d   :  { %1442 = vpow2.f32 %v1179_v20 }
 0x975   :  { %v1441_v19 = vpop.eup %1440 }
 0x976   :  { %590 = vrot.lane.b32.xlu1 %v1441_v19, %s1657_s25 }
 0x977   :  { %v1443_v21 = vpop.eup %1442 }
 0x978   :  { %v584_v22 = vadd.f32 1.0, %v1443_v21 }
 0x97a   :  { %1444 = vrcp.f32 %v584_v22 }
 0x984   :  { %v1445_v23 = vpop.eup %1444 }
 0x985   :  { %v588_v26 = vmul.f32 %v1445_v23, %v495_v9 }
 0x9e8   :  { %v591_v24 = vpop.permute.xlu1 %590 }
 0x9e9   :  { %v593_v25 = vmul.f32 %v1445_v23, %v591_v24  ;;  %v919_v24 = vld [vmem:[#allocation2 + $0x7] sm:$0x1] }
 0x9eb   :  { %595 = vrot.lane.b32.xlu0 %v593_v25, %s1658_s5 }
 0xa5d   :  { %v596_v27 = vpop.permute.xlu0 %595 }
 0xa5e   :  { %v598_v28 = vadd.f32 %v596_v27, %v588_v26 }
 0xa60   :  { %1446 = vtanh.f32 %v598_v28 }
 0xa6a   :  { %v1447_v29 = vpop.eup %1446 }
 0xa6b   :  { %601 = vrot.lane.b32.xlu1 %v1447_v29, %s1657_s25 }
 0xadd   :  { %v602_v30 = vpop.permute.xlu1 %601 }
 0xade   :  { %v604_v31 = vmul.f32 %v1445_v23, %v602_v30 }
 0xae0   :  { %606 = vrot.lane.b32.xlu0 %v604_v31, %s1658_s5 }
 0xb52   :  { %v607_v32 = vpop.permute.xlu0 %606 }
 0xb53   :  { %609 = vst.msk [vmem:[#allocation3 + $0x3] sm:$0x1] %vm92_vm1, %v607_v32  ;;  %1298 = vmatmul.mubr.msk.f32.vlgmr.msra.gmra.mrb[4].mxu1 %vm188_vm3, %v607_v32 }
 0xb54   :  { %1385 = vmatpush3.bf16.msra.mxu1 %v1781_v8  ;;  %1319 = vmatprep.mubr.msk.f32.mxu1 %vm1655_vm0, %v1656_v1 }
 0xb55   :  { %1386 = vmatprep.subr.bf16.mxu1 %v1654_v0 }
 0xb58   :  { %1388 = vmatpush3.bf16.msra.mxu1 %v1788_v12 }
 0xb59   :  { %1395 = vmatprep.subr.bf16.mxu1 %v1654_v0 }
 0xc26   :  { %v679_v34 = vpop.f32.mrb[4].mxu1 }
 0xc27   :  { %v683_v35 = vadd.f32 %v679_v34, %v610_v33  ;;  %v1299_v36 = vpop.f32.mrb[5].mxu1 }
 0xc29   :  { %1448 = vtanh.f32 %v683_v35  ;;  %v1181_v38 = vmul.f32 -1.442695, %v683_v35 }
 0xc2b   :  { %1450 = vpow2.f32 %v1181_v38 }
 0xc33   :  { %v1449_v37 = vpop.eup %1448 }
 0xc34   :  { %693 = vrot.lane.b32.xlu1 %v1449_v37, %s1657_s25 }
 0xc35   :  { %v1451_v39 = vpop.eup %1450 }
 0xc36   :  { %v687_v40 = vadd.f32 1.0, %v1451_v39  ;;  %v1029_v39 = vld [vmem:[#allocation10] sm:$0xff] }
 0xc38   :  { %1452 = vrcp.f32 %v687_v40  ;;  %v1030_v40 = vld [vmem:[#allocation10 + $0x8] sm:$0xff] }
 0xc42   :  { %v1453_v41 = vpop.eup %1452 }
 0xc43   :  { %v691_v44 = vmul.f32 %v1453_v41, %v598_v28 }
 0xca6   :  { %v694_v42 = vpop.permute.xlu1 %693 }
 0xca7   :  { %v696_v43 = vmul.f32 %v1453_v41, %v694_v42  ;;  %v1396_v42 = vpack.c.bf16 %v1030_v40, %v1029_v39 }
 0xca9   :  { %698 = vrot.lane.b32.xlu0 %v696_v43, %s1658_s5  ;;  %v1032_v43 = vld [vmem:[#allocation10 + $0x18] sm:$0xff] }
 0xd1b   :  { %v699_v45 = vpop.permute.xlu0 %698 }
 0xd1c   :  { %v701_v46 = vadd.f32 %v699_v45, %v691_v44 }
 0xd1e   :  { %1454 = vtanh.f32 %v701_v46 }
 0xd28   :  { %v1455_v47 = vpop.eup %1454 }
 0xd29   :  { %704 = vrot.lane.b32.xlu1 %v1455_v47, %s1657_s25 }
 0xd9b   :  { %v705_v48 = vpop.permute.xlu1 %704 }
 0xd9c   :  { %v707_v49 = vmul.f32 %v1453_v41, %v705_v48  ;;  %v1031_v41 = vld [vmem:[#allocation10 + $0x10] sm:$0xff] }
 0xd9d   :  { %v1399_v44 = vpack.c.bf16 %v1032_v43, %v1031_v41 }
 0xd9e   :  { %709 = vrot.lane.b32.xlu0 %v707_v49, %s1658_s5  ;;  %v1188_v49 = vld [vmem:[%s1943_s7] ss:$0 sm:$0xff] }
 0xe10   :  { %v710_v50 = vpop.permute.xlu0 %709 }
 0xe11   :  { %712 = vst.msk [vmem:[#allocation3 + $0x4] sm:$0x1] %vm92_vm1, %v710_v50  ;;  %1309 = vmatmul.mubr.msk.f32.vlgmr.msra.gmra.mrb[6].mxu0 %vm188_vm3, %v710_v50 }
 0xe12   :  { %1391 = vmatpush3.bf16.msra.mxu0 %v1781_v8  ;;  %1330 = vmatprep.mubr.msk.f32.mxu0 %vm1655_vm0, %v1656_v1 }
 0xe13   :  { %1392 = vmatprep.subr.bf16.mxu0 %v1654_v0 }
 0xe16   :  { %1394 = vmatpush3.bf16.msra.mxu0 %v1788_v12 }
 0xee4   :  { %v782_v52 = vpop.f32.mrb[6].mxu0 }
 0xee5   :  { %v786_v53 = vadd.f32 %v782_v52, %v713_v51  ;;  %v1310_v54 = vpop.f32.mrb[7].mxu0 }
 0xee7   :  { %1456 = vtanh.f32 %v786_v53  ;;  %v1183_v56 = vmul.f32 -1.442695, %v786_v53 }
 0xee9   :  { %1458 = vpow2.f32 %v1183_v56 }
 0xef1   :  { %v1457_v55 = vpop.eup %1456 }
 0xef2   :  { %796 = vrot.lane.b32.xlu1 %v1457_v55, %s1657_s25 }
 0xef3   :  { %v1459_v57 = vpop.eup %1458 }
 0xef4   :  { %v790_v58 = vadd.f32 1.0, %v1459_v57 }
 0xef6   :  { %1460 = vrcp.f32 %v790_v58 }
 0xf00   :  { %v1461_v8 = vpop.eup %1460 }
 0xf01   :  { %v794_v61 = vmul.f32 %v1461_v8, %v701_v46 }
 0xf64   :  { %v797_v59 = vpop.permute.xlu1 %796 }
 0xf65   :  { %v799_v60 = vmul.f32 %v1461_v8, %v797_v59 }
 0xf67   :  { %801 = vrot.lane.b32.xlu0 %v799_v60, %s1658_s5 }
 0xfd9   :  { %v802_v12 = vpop.permute.xlu0 %801 }
 0xfda   :  { %v804_v62 = vadd.f32 %v802_v12, %v794_v61 }
 0xfdc   :  { %1462 = vtanh.f32 %v804_v62 }
 0xfe6   :  { %v1463_v63 = vpop.eup %1462 }
 0xfe7   :  { %807 = vrot.lane.b32.xlu1 %v1463_v63, %s1657_s25 }
0x1059   :  { %v808_v2 = vpop.permute.xlu1 %807 }
0x105a   :  { %v810_v3 = vmul.f32 %v1461_v8, %v808_v2 }
0x105c   :  { %812 = vrot.lane.b32.xlu0 %v810_v3, %s1658_s5 }
0x10ce   :  { %v813_v4 = vpop.permute.xlu0 %812 }
0x10cf   :  { %815 = vst.msk [vmem:[#allocation3 + $0x5] sm:$0x1] %vm92_vm1, %v813_v4  ;;  %1320 = vmatmul.mubr.msk.f32.vlgmr.msra.gmra.mrb[6].mxu1 %vm188_vm3, %v813_v4 }
0x10d0   :  { %1341 = vmatprep.mubr.msk.f32.mxu1 %vm1655_vm0, %v1656_v1  ;;  %1397 = vmatpush3.bf16.msra.mxu1 %v1396_v42 }
0x10d1   :  { %1398 = vmatprep.subr.bf16.mxu1 %v1654_v0 }
0x10d4   :  { %1400 = vmatpush3.bf16.msra.mxu1 %v1399_v44 }
0x11a2   :  { %v885_v6 = vpop.f32.mrb[6].mxu1 }
0x11a3   :  { %v889_v7 = vadd.f32 %v885_v6, %v816_v5  ;;  %v1321_v9 = vpop.f32.mrb[7].mxu1 }
0x11a5   :  { %1464 = vtanh.f32 %v889_v7  ;;  %v1185_v11 = vmul.f32 -1.442695, %v889_v7 }
0x11a7   :  { %1466 = vpow2.f32 %v1185_v11 }
0x11af   :  { %v1465_v10 = vpop.eup %1464 }
0x11b0   :  { %899 = vrot.lane.b32.xlu1 %v1465_v10, %s1657_s25 }
0x11b1   :  { %v1467_v13 = vpop.eup %1466 }
0x11b2   :  { %v893_v14 = vadd.f32 1.0, %v1467_v13 }
0x11b4   :  { %1468 = vrcp.f32 %v893_v14 }
0x11be   :  { %v1469_v15 = vpop.eup %1468 }
0x11bf   :  { %v897_v18 = vmul.f32 %v1469_v15, %v804_v62 }
0x1222   :  { %v900_v16 = vpop.permute.xlu1 %899 }
0x1223   :  { %v902_v17 = vmul.f32 %v1469_v15, %v900_v16 }
0x1225   :  { %904 = vrot.lane.b32.xlu0 %v902_v17, %s1658_s5 }
0x1297   :  { %v905_v1 = vpop.permute.xlu0 %904 }
0x1298   :  { %v907_v19 = vadd.f32 %v905_v1, %v897_v18 }
0x129a   :  { %1470 = vtanh.f32 %v907_v19 }
0x12a4   :  { %v1471_v20 = vpop.eup %1470 }
0x12a5   :  { %910 = vrot.lane.b32.xlu1 %v1471_v20, %s1657_s25 }
0x1317   :  { %v911_v21 = vpop.permute.xlu1 %910 }
0x1318   :  { %v913_v22 = vmul.f32 %v1469_v15, %v911_v21 }
0x131a   :  { %915 = vrot.lane.b32.xlu0 %v913_v22, %s1658_s5 }
0x138c   :  { %v916_v23 = vpop.permute.xlu0 %915 }
0x138d   :  { %918 = vst.msk [vmem:[#allocation3 + $0x6] sm:$0x1] %vm92_vm1, %v916_v23  ;;  %1331 = vmatmul.mubr.msk.f32.vlgmr.msra.gmra.mrb[8].mxu0 %vm188_vm3, %v916_v23 }
0x1460   :  { %v988_v25 = vpop.f32.mrb[8].mxu0 }
0x1461   :  { %v992_v26 = vadd.f32 %v988_v25, %v919_v24  ;;  %v1332_v27 = vpop.f32.mrb[9].mxu0 }
0x1463   :  { %1472 = vtanh.f32 %v992_v26  ;;  %v1187_v29 = vmul.f32 -1.442695, %v992_v26 }
0x1465   :  { %1474 = vpow2.f32 %v1187_v29 }
0x146d   :  { %v1473_v28 = vpop.eup %1472 }
0x146e   :  { %1002 = vrot.lane.b32.xlu1 %v1473_v28, %s1657_s25 }
0x146f   :  { %v1475_v30 = vpop.eup %1474 }
0x1470   :  { %v996_v31 = vadd.f32 1.0, %v1475_v30 }
0x1472   :  { %1476 = vrcp.f32 %v996_v31 }
0x147c   :  { %v1477_v32 = vpop.eup %1476 }
0x147d   :  { %v1000_v35 = vmul.f32 %v1477_v32, %v907_v19 }
0x14e0   :  { %v1003_v33 = vpop.permute.xlu1 %1002 }
0x14e1   :  { %v1005_v34 = vmul.f32 %v1477_v32, %v1003_v33 }
0x14e3   :  { %1007 = vrot.lane.b32.xlu0 %v1005_v34, %s1658_s5 }
0x1555   :  { %v1008_v36 = vpop.permute.xlu0 %1007 }
0x1556   :  { %v1010_v37 = vadd.f32 %v1008_v36, %v1000_v35 }
0x1558   :  { %1478 = vtanh.f32 %v1010_v37 }
0x1562   :  { %v1479_v38 = vpop.eup %1478 }
0x1563   :  { %1013 = vrot.lane.b32.xlu1 %v1479_v38, %s1657_s25 }
0x15d5   :  { %v1014_v45 = vpop.permute.xlu1 %1013 }
0x15d6   :  { %v1016_v46 = vmul.f32 %v1477_v32, %v1014_v45 }
0x15d8   :  { %1018 = vrot.lane.b32.xlu0 %v1016_v46, %s1658_s5 }
0x164a   :  { %v1019_v47 = vpop.permute.xlu0 %1018 }
0x164b   :  { %1021 = vst.msk [vmem:[#allocation3 + $0x7] sm:$0x1] %vm92_vm1, %v1019_v47  ;;  %1022 = vst.msk [vmem:[#allocation13] sm:$0x1] %vm92_vm1, %v1019_v47 }
0x1652   :  { %v1028_v48 = vld [vmem:[#allocation3] sm:$0xff] }
0x1653   :  { %1342 = vmatmul.mubr.msk.f32.vlgmr.msra.gmra.mrb[8].mxu1 %vm188_vm3, %v1028_v48 }
0x1726   :  { %v1109_v50 = vpop.f32.mrb[8].mxu1 }
0x1727   :  { %v1110_v51 = vadd.f32 %v1188_v49, %v1109_v50  ;;  %v1343_v0 = vpop.f32.mrb[9].mxu1 }
0x1729   :  { %1113 = vmax.xlane.f32.xlu1 %v1110_v51 }
0x17b6   :  { %v1114_v52 = vpop.xlane.xlu1 %1113 }
0x17b7   :  { %v1115_v53 = vsub.f32 %v1110_v51, %v1114_v52 }
0x17b9   :  { %v1116_v54 = vmul.f32 1.442695, %v1115_v53 }
0x17bb   :  { %1480 = vpow2.f32 %v1116_v54 }
0x17c5   :  { %v1481_v55 = vpop.eup %1480 }
0x17c6   :  { %1118 = vadd.xlane.f32.xlu0 %v1481_v55 }
0x17dc   :  { %1024 = vrot.lane.b32.xlu0 %v1010_v37, %s1659_s27 }
0x17dd   :  { %1583 = shalt.err (!%p1580_p8)
}
0x17de   :  { %s1584_s13 = scalar_lea.hbm %s1945_s9, 16 }
0x17df   :  { %p1585_p9 = scmp.ne.s32.totalorder %s1945_s9, %s1584_s13  ;;  %p1588_p10 = scmp.lt.u32.totalorder %s1584_s13, %s1945_s9 }
0x17e1   :  { %p1590_p11 = pnand %p1588_p10, %p1585_p9 }
0x17e3   :  { %1593 = shalt.err (!%p1590_p11)
}
0x17e4   :  { %1144 = dma.vmem_to_hbm [thread:$0]  %s1142_s11, 16, %s1945_s9, [#allocation14]  }
0x17e5   :  { %s1661_s19 = smov [#allocation15]  }
0x17e6   :  { %s1151_s20 = sshll.u32 %s1661_s19, 4  ;;  %s1152_s20 = int_to_ptr.vmem [resolvable:$true] %s1151_s20 }
0x17e7   :  { %s1594_s2 = scalar_lea.vmem %s1152_s20, 16  ;;  %s1598_s30 = scalar_lea.vmem %s1152_s20, 32 }
0x17e8   :  { %p1595_p12 = scmp.ne.s32.totalorder %s1152_s20, %s1594_s2  ;;  %p1599_p13 = scmp.lt.s32.totalorder %s1152_s20, %s1152_s20 }
0x17e9   :  { %p1600_p0 = scmp.lt.s32.totalorder %s1598_s30, %s1594_s2 }
0x17eb   :  { %p1601_p1 = por %p1600_p0, %p1599_p13 }
0x17ed   :  { %p1602_p2 = pnand %p1601_p1, %p1595_p12 }
0x1853   :  { %v1119_v56 = vpop.xlane.xlu0 %1118 }
0x1854   :  { %1482 = vlog2.f32 %v1119_v56 }
0x1857   :  { %v1025_v57 = vpop.permute.xlu0 %1024 }
0x1858   :  { %1027 = vst.msk [vmem:[#allocation15] sm:$0x1] %vm92_vm1, %v1025_v57 }
0x1859   :  { %1605 = shalt.err (!%p1602_p2)
}
0x185a   :  { %s1606_s9 = scalar_lea.hbm %s1946_s10, 16 }
0x185b   :  { %p1607_p3 = scmp.ne.s32.totalorder %s1946_s10, %s1606_s9  ;;  %p1610_p4 = scmp.lt.u32.totalorder %s1606_s9, %s1946_s10 }
0x185d   :  { %p1612_p5 = pnand %p1610_p4, %p1607_p3 }
0x185f   :  { %1615 = shalt.err (!%p1612_p5)
}
0x1860   :  { %1154 = dma.vmem_to_hbm [thread:$0]  %s1152_s20, 16, %s1946_s10, [#allocation14]   ;;  %v1483_v58 = vpop.eup %1482 }
0x1861   :  { %v1121_v8 = vmul.f32 0.6931472, %v1483_v58  ;;  %s1662_s3 = smov [#allocation12]  }
0x1862   :  { %s1131_s26 = sshll.u32 %s1662_s3, 4  ;;  %s1132_s26 = int_to_ptr.vmem [resolvable:$true] %s1131_s26 }
0x1863   :  { %v1122_v59 = vadd.f32 %v1121_v8, %v1114_v52  ;;  %s1616_s27 = scalar_lea.vmem %s1132_s26, 128  ;;  %p1621_p7 = scmp.lt.s32.totalorder %s1132_s26, %s1132_s26 }
0x1864   :  { %p1617_p6 = scmp.ne.s32.totalorder %s1132_s26, %s1616_s27  ;;  %p1622_p8 = scmp.lt.s32.totalorder %s1616_s27, %s1616_s27 }
0x1865   :  { %v1123_v60 = vsub.f32 %v1110_v51, %v1122_v59 }
0x1866   :  { %p1623_p9 = por %p1622_p8, %p1621_p7 }
0x1867   :  { %1124 = vst [vmem:[#allocation12] sm:$0xff] %v1123_v60 }
0x1868   :  { %p1624_p10 = pnand %p1623_p9, %p1617_p6 }
0x186a   :  { %1627 = shalt.err (!%p1624_p10)
}
0x186b   :  { %s1628_s0 = scalar_lea.hbm %s1944_s8, 128 }
0x186c   :  { %p1629_p11 = scmp.ne.s32.totalorder %s1944_s8, %s1628_s0  ;;  %p1632_p12 = scmp.lt.u32.totalorder %s1628_s0, %s1944_s8 }
0x186e   :  { %p1634_p13 = pnand %p1632_p12, %p1629_p11 }
0x1870   :  { %1637 = shalt.err (!%p1634_p13)
}
0x1871   :  { %1134 = dma.vmem_to_hbm [thread:$0]  %s1132_s26, 128, %s1944_s8, [#allocation6]  }
0x1872   :  { %1644 = dma.done.wait [#allocation6], 128  }
0x1873   :  { %1645 = vsyncadd [#allocation6], 4294967168 }
0x1874   :  { %1646 = dma.done.wait [#allocation14], 32  }
0x1875   :  { %1647 = vsyncadd [#allocation14], 4294967264 }
0x1876   :  { %1164 = vsyncpa [#allocation5], 1 }
0x1877   :  { %1165 = vsyncpa [#allocation8], 1 }
0x1878   :  { %1166 = vsyncpa [#allocation11], 1 }
0x1879   :  { %1167 = vsyncpa [#allocation6], 1 }
0x187a   :  { %1168 = vsyncpa [#allocation14], 1 }

</bundles_post_ra>
